<compile_context>
chip_gen: v6e
topology: v6e:2x2x1
jax: 0.10.0
libtpu: 0.0.40
codegen_flags: <defaults>
</compile_context>

<pallas_src>
import functools

import jax
import jax.numpy as jnp
from jax.experimental import pallas as pl
from jax.experimental.pallas import tpu as pltpu


def wemb_kernel(ids_ref, table_ref, a2_ref, b2_ref, o_ref, *, eps):
    ids = ids_ref[...]                                   # (R, 1) int32
    R = ids.shape[0]
    V, D = table_ref.shape

    # --- Word_Emb: fused dual-table lookup as ONE bf16 one-hot matmul (MXU) ---
    # table = concat([Emb1, Emb2]); row index for table-2 entries is
    # part_point + (ids - part_point) = ids, so the one-hot is just ids == iota.
    # Out-of-range ids (>= V) yield an all-zero row (reference torch would error).
    iota = jax.lax.broadcasted_iota(jnp.int32, (R, V), 1)
    onehot = (ids == iota).astype(jnp.bfloat16)          # 0/1 exact in bf16
    emb = jnp.dot(onehot, table_ref[...], preferred_element_type=jnp.float32)

    # add_n over wembs: Position_Emb.forward is a no-op in the reference module,
    # so the sum reduces to the word embedding itself.

    # --- LayerNorm (torch x.std() semantics: unbiased variance, eps added to std) ---
    mean = jnp.mean(emb, axis=-1, keepdims=True)
    centered = emb - mean
    var = jnp.sum(centered * centered, axis=-1, keepdims=True) / (D - 1)
    std = jnp.sqrt(var)
    inv = pl.reciprocal(std + eps, approx=True)           # EUP; keeps VALU slots free
    out = a2_ref[...] * centered * inv + b2_ref[...]

    # TODO(synk): training-mode stochastic dropout not implemented (identity / eval mode).
    o_ref[...] = out.astype(o_ref.dtype)


def wemb_forward(inp_ids, params, *, part_point, rows_block=None, eps=1e-6,
                 out_dtype=jnp.float32, vmem_limit_bytes=None):
    """Runs Wemb.forward for int token ids of shape (B, S); returns (B, S, D)."""
    B, S = inp_ids.shape
    emb1 = params["emb1"]
    emb2 = params["emb2"]
    a2 = params["a2"].reshape(1, -1)
    b2 = params["b2"].reshape(1, -1)
    V1, D = emb1.shape
    V2, D2 = emb2.shape
    assert D == D2
    # Correctness guard: the fused (ids == iota) one-hot is only equivalent to the
    # reference's masked dual lookup when the trainable table has exactly
    # `part_point` rows (as the reference module constructs it).
    assert V1 == part_point, "emb1 must have exactly part_point rows"

    table = jnp.concatenate([emb1, emb2], axis=0).astype(jnp.bfloat16)
    V = V1 + V2

    N = B * S
    if rows_block is None:
        # >=2 grid steps (pipelining + megacore) and 256-row MXU cadence on v6e/v7x.
        rows_block = 256 if N % 256 == 0 else N
    assert N % rows_block == 0 and rows_block % 8 == 0, "row block must be sublane aligned"

    ids2d = inp_ids.reshape(N, 1).astype(jnp.int32)

    if vmem_limit_bytes is None:
        # Leave headroom: ~75% of physical VMEM (48 MiB on v7x, ~96 MiB on v5e/v6e).
        try:
            cap = pltpu.get_tpu_info().vmem_capacity_bytes
            vmem_limit_bytes = min(int(cap * 3 // 4), 100 * 1024 * 1024)
        except Exception:
            vmem_limit_bytes = 48 * 1024 * 1024

    kernel = functools.partial(wemb_kernel, eps=eps)

    out_flat = pl.pallas_call(
        kernel,
        out_shape=jax.ShapeDtypeStruct((N, D), out_dtype),
        grid_spec=pltpu.PrefetchScalarGridSpec(
            num_scalar_prefetch=0,
            grid=(N // rows_block,),
            in_specs=[
                pl.BlockSpec((rows_block, 1), lambda i: (i, 0)),   # token ids
                # Concatenated embedding table: grid-invariant -> single-buffered
                # so it is not double-counted in VMEM (critical on v7x).
                pl.BlockSpec((V, D), lambda i: (0, 0),
                             pipeline_mode=pl.Buffered(1)),
                pl.BlockSpec((1, D), lambda i: (0, 0)),            # LayerNorm a_2
                pl.BlockSpec((1, D), lambda i: (0, 0)),            # LayerNorm b_2
            ],
            out_specs=pl.BlockSpec((rows_block, D), lambda i: (i, 0)),
        ),
        compiler_params=pltpu.CompilerParams(
            dimension_semantics=("parallel",),
            vmem_limit_bytes=vmem_limit_bytes,
        ),
    )(ids2d, table, a2, b2)

    return out_flat.reshape(B, S, D)


def wemb_reference(inp_ids, params, *, part_point, eps=1e-6):
    """Pure-JAX replica of Wemb.forward (torch semantics, f32 tables) for validation."""
    emb1, emb2, a2, b2 = params["emb1"], params["emb2"], params["a2"], params["b2"]
    mask = (inp_ids < part_point)
    idx1 = jnp.where(mask, inp_ids, 0)
    idx2 = jnp.where(mask, 0, inp_ids - part_point)
    e = (emb1[idx1] * mask[..., None].astype(jnp.float32)
         + emb2[idx2] * (~mask)[..., None].astype(jnp.float32))
    mean = jnp.mean(e, axis=-1, keepdims=True)
    var = jnp.sum((e - mean) ** 2, axis=-1, keepdims=True) / (e.shape[-1] - 1)
    std = jnp.sqrt(var)
    return a2.reshape(-1) * (e - mean) / (std + eps) + b2.reshape(-1)


if __name__ == "__main__":
    # Small shapes consistent with the module: (batch, seq) int token ids -> (batch, seq, dim_emb).
    batch, seq = 2, 16
    dim_emb = 128            # lane-dense embedding width
    size_vocab = 64
    part_point = 32          # ids < part_point use the trainable table, else the pre-trained one

    key = jax.random.PRNGKey(0)
    k_ids, k_e1, k_e2 = jax.random.split(key, 3)
    inp = jax.random.randint(k_ids, (batch, seq), 0, size_vocab, dtype=jnp.int32)
    params = {
        "emb1": 0.02 * jax.random.normal(k_e1, (part_point, dim_emb), jnp.float32),
        "emb2": 0.02 * jax.random.normal(k_e2, (size_vocab - part_point, dim_emb), jnp.float32),
        "a2": jnp.ones((1, dim_emb), jnp.float32),
        "b2": jnp.zeros((1, dim_emb), jnp.float32),
    }

    out = wemb_forward(inp, params, part_point=part_point, rows_block=16)
    jax.block_until_ready(out)

    ref = wemb_reference(inp, params, part_point=part_point)
    jax.block_until_ready(ref)

    assert out.shape == (batch, seq, dim_emb)
    max_err = float(jnp.max(jnp.abs(out - ref)))
    assert max_err < 2e-2, f"mismatch vs reference: {max_err}"
    print("KERNEL_OK")
</pallas_src>

<mosaic_0001>
module attributes {stable_mosaic.version = 11 : i64} {
  func.func @wemb_kernel(%arg0: i32, %arg1: memref<16x1xi32, #tpu.memory_space<vmem>>, %arg2: memref<64x128xbf16, #tpu.memory_space<vmem>>, %arg3: memref<1x128xf32, #tpu.memory_space<vmem>>, %arg4: memref<1x128xf32, #tpu.memory_space<vmem>>, %arg5: memref<16x128xf32, #tpu.memory_space<vmem>>) attributes {dimension_semantics = [#tpu.dimension_semantics<parallel>], iteration_bounds = array<i64: 2>, scalar_prefetch = 0 : i64, scratch_operands = 0 : i64, tpu.core_type = #tpu.core_type<tc>, window_params = [{transform_indices = @transform_0, window_bounds = array<i64: 16, 1>}, {pipeline_mode = #tpu.pipeline_mode<synchronous>, transform_indices = @transform_1, window_bounds = array<i64: 64, 128>}, {pipeline_mode = #tpu.pipeline_mode<synchronous>, transform_indices = @transform_2, window_bounds = array<i64: 1, 128>}, {pipeline_mode = #tpu.pipeline_mode<synchronous>, transform_indices = @transform_3, window_bounds = array<i64: 1, 128>}, {transform_indices = @transform_4, window_bounds = array<i64: 16, 128>}]} {
    %c0 = arith.constant 0 : index
    %c0_0 = arith.constant 0 : index
    %0 = vector.load %arg1[%c0, %c0_0] : memref<16x1xi32, #tpu.memory_space<vmem>>, vector<16x1xi32>
    %1 = tpu.iota {dimensions = array<i32: 1>} : vector<16x64xi32>
    %2 = vector.broadcast %0 : vector<16x1xi32> to vector<16x64xi32>
    %3 = arith.cmpi eq, %2, %1 : vector<16x64xi32>
    %4 = arith.extui %3 : vector<16x64xi1> to vector<16x64xi32>
    %5 = arith.sitofp %4 : vector<16x64xi32> to vector<16x64xf32>
    %6 = arith.truncf %5 : vector<16x64xf32> to vector<16x64xbf16>
    %c0_1 = arith.constant 0 : index
    %c0_2 = arith.constant 0 : index
    %7 = vector.load %arg2[%c0_1, %c0_2] : memref<64x128xbf16, #tpu.memory_space<vmem>>, vector<64x128xbf16>
    %cst = arith.constant dense<0.000000e+00> : vector<16x128xf32>
    %8 = tpu.matmul %6, %7, %cst {dimension_numbers = #tpu.dot_dimension_numbers<[1], [0], [0], [1], [0, 0, 1, 1], [], []>} : vector<16x64xbf16>, vector<64x128xbf16>, vector<16x128xf32> -> vector<16x128xf32>
    %cst_3 = arith.constant dense<0.000000e+00> : vector<16xf32>
    %9 = vector.multi_reduction <add>, %8, %cst_3 [1] : vector<16x128xf32> to vector<16xf32>
    %10 = vector.shape_cast %9 : vector<16xf32> to vector<16x1xf32>
    %cst_4 = arith.constant 1.280000e+02 : f32
    %11 = vector.broadcast %cst_4 : f32 to vector<16x1xf32>
    %12 = arith.divf %10, %11 : vector<16x1xf32>
    %13 = vector.broadcast %12 : vector<16x1xf32> to vector<16x128xf32>
    %14 = arith.subf %8, %13 : vector<16x128xf32>
    %15 = arith.mulf %14, %14 : vector<16x128xf32>
    %cst_5 = arith.constant dense<0.000000e+00> : vector<16xf32>
    %16 = vector.multi_reduction <add>, %15, %cst_5 [1] : vector<16x128xf32> to vector<16xf32>
    %17 = vector.shape_cast %16 : vector<16xf32> to vector<16x1xf32>
    %cst_6 = arith.constant 1.270000e+02 : f32
    %18 = vector.broadcast %cst_6 : f32 to vector<16x1xf32>
    %19 = arith.divf %17, %18 : vector<16x1xf32>
    %20 = math.sqrt %19 : vector<16x1xf32>
    %cst_7 = arith.constant 9.99999997E-7 : f32
    %21 = vector.broadcast %cst_7 : f32 to vector<16x1xf32>
    %22 = arith.addf %20, %21 : vector<16x1xf32>
    %23 = tpu.reciprocal %22 {approx = true} : vector<16x1xf32> -> vector<16x1xf32>
    %c0_8 = arith.constant 0 : index
    %c0_9 = arith.constant 0 : index
    %24 = vector.load %arg3[%c0_8, %c0_9] : memref<1x128xf32, #tpu.memory_space<vmem>>, vector<1x128xf32>
    %25 = vector.broadcast %24 : vector<1x128xf32> to vector<16x128xf32>
    %26 = arith.mulf %25, %14 : vector<16x128xf32>
    %27 = vector.broadcast %23 : vector<16x1xf32> to vector<16x128xf32>
    %28 = arith.mulf %26, %27 : vector<16x128xf32>
    %c0_10 = arith.constant 0 : index
    %c0_11 = arith.constant 0 : index
    %29 = vector.load %arg4[%c0_10, %c0_11] : memref<1x128xf32, #tpu.memory_space<vmem>>, vector<1x128xf32>
    %30 = vector.broadcast %29 : vector<1x128xf32> to vector<16x128xf32>
    %31 = arith.addf %28, %30 : vector<16x128xf32>
    %c0_12 = arith.constant 0 : index
    %c0_13 = arith.constant 0 : index
    %32 = vector.load %arg5[%c0_12, %c0_13] : memref<16x128xf32, #tpu.memory_space<vmem>>, vector<16x128xf32>
    tpu.vector_store %arg5[%c0_12, %c0_13], %31 {strides = array<i32>} : memref<16x128xf32, #tpu.memory_space<vmem>>, vector<16x128xf32>,
    return
  }
  func.func @transform_0(%arg0: i32) -> (i32, i32) {
    %c0_i32 = arith.constant 0 : i32
    %c0_i32_0 = arith.constant 0 : i32
    return %arg0, %c0_i32 : i32, i32
  }
  func.func @transform_1(%arg0: i32) -> (i32, i32) {
    %c0_i32 = arith.constant 0 : i32
    %c0_i32_0 = arith.constant 0 : i32
    %c0_i32_1 = arith.constant 0 : i32
    return %c0_i32, %c0_i32_0 : i32, i32
  }
  func.func @transform_2(%arg0: i32) -> (i32, i32) {
    %c0_i32 = arith.constant 0 : i32
    %c0_i32_0 = arith.constant 0 : i32
    %c0_i32_1 = arith.constant 0 : i32
    return %c0_i32, %c0_i32_0 : i32, i32
  }
  func.func @transform_3(%arg0: i32) -> (i32, i32) {
    %c0_i32 = arith.constant 0 : i32
    %c0_i32_0 = arith.constant 0 : i32
    %c0_i32_1 = arith.constant 0 : i32
    return %c0_i32, %c0_i32_0 : i32, i32
  }
  func.func @transform_4(%arg0: i32) -> (i32, i32) {
    %c0_i32 = arith.constant 0 : i32
    %c0_i32_0 = arith.constant 0 : i32
    return %arg0, %c0_i32 : i32, i32
  }
}

</mosaic_0001>

<bundles_post_ra>
// kernel: tpu_custom_call.1
= control target key start
LH: loop header
LB: loop body
LE: loop exit
PB: predicated region body
PF: predicated region fallthrough
CT: control target
= control target key end

     0   :  { %9 = vsyncpa [#allocation3], 0  ;;  %s736_s0 = inlined_call_operand.vmem [shape: s32[32,1], index: 0, kind: input, shape index: {}]   ;;  %s737_s1 = inlined_call_operand.vmem [shape: bf16[64,128], index: 1, kind: input, shape index: {}]   ;;  %s738_s2 = inlined_call_operand.vmem [shape: f32[1,128], index: 2, kind: input, shape index: {}]   ;;  %s739_s3 = inlined_call_operand.vmem [shape: f32[1,128], index: 3, kind: input, shape index: {}]   ;;  %s740_s4 = inlined_call_operand.hbm [shape: f32[32,128], index: 4, kind: output, shape index: {}]  }
   0x1   :  { %11 = vsyncpa [#allocation3 + $0x1], 0  ;;  %s617_s15 = smov 0   ;;  %s619_s16 = smov 0  }
   0x2   :  { %s621_s17 = smov 0   ;;  %s623_s18 = smov 0  }
   0x3 LB: > { %s638_s19 = sadd.s32 4294967295, %s584_s18   ;;  %s428_s20 = sadd.s32 4294967294, %s584_s18   ;;  %s584_s18 = sphi %s623_s18, %s746_s18   ;;  %s580_s17 = sphi %s621_s17, %s745_s17   ;;  %s576_s16 = sphi %s619_s16, %s744_s16   ;;  %s572_s15 = sphi %s617_s15, %s743_s15  }
   0x4   : > { %s642_s21 = sadd.s32 1, %s584_s18   ;;  %s113_s22 = sadd.s32 1, %s580_s17 }
   0x5   : > { %s110_s23 = ssub.s32 %s584_s18, %s642_s21  ;;  %p123_p0 = scmp.ne.s32.totalorder %s580_s17, %s576_s16 }
   0x6   : > { %p111_p1 = scmp.eq.s32.totalorder %s110_s23, 0  ;;  %p124_p2 = scmp.eq.s32.totalorder %s638_s19, 1 }
   0x7   : > { %p129_p3 = scmp.ne.s32.totalorder %s576_s16, %s572_s15  ;;  %p130_p4 = scmp.eq.s32.totalorder %s428_s20, 1 }
   0x8   : > { %s653_s24 = scalar_select %p111_p1, %s580_s17, %s113_s22  }
   0x9   : > { %p655_p5 = por %p124_p2, %p123_p0  ;;  %p659_p6 = por %p130_p4, %p129_p3 }
   0xa   : > { %p431_p7 = scmp.ge.s32.totalorder %s584_s18, 1  ;;  %p166_p8 = scmp.lt.s32.totalorder %s584_s18, 3 }
   0xc   : > { %p167_p9 = pnand %p431_p7, %p166_p8 }
   0xd   : > { %s433_s27 = sshll.u32 (!%p167_p9), %s638_s19, 1  ;;  %s189_s22 = sand.u32 (!%p167_p9), 1, %s576_s16  }
   0xe   : > { %170 = sbr.rel (%p167_p9) target bundleno = 688 (0x2b0), region = 36  ;;  %p193_p10 = scmp.lt.s32.totalorder (!%p167_p9), %s433_s27, 3 }
   0xf   : > { %s432_s23 = sshll.u32 (!%p167_p9), %s189_s22, 4  ;;  %s449_s29 = sshll.u32 (!%p167_p9), %s638_s19, 8 }
  0x10   : > { %s191_s30 = scalar_lea.vmem (!%p167_p9), [#allocation2], %s432_s23  ;;  %s692_s8 = scalar_lea.hbm (!%p167_p9), %s740_s4, %s449_s29 }
  0x11   : > { %s366_s5 = sshll.u32 (!%p167_p9), %s191_s30, 4  ;;  %s589_s10 = smov (!%p167_p9), [#allocation2]   ;;  %s694_s5 = int_to_ptr.vmem [resolvable:$true] %s366_s5 }
  0x12   : > { %s524_s19 = scalar_lea.vmem (!%p167_p9), %s694_s5, 256  ;;  %s528_s11 = sshll.u32 (!%p167_p9), %s589_s10, 4  ;;  %s529_s11 = int_to_ptr.vmem [resolvable:$false] %s528_s11 }
  0x13   : > { %v512_v0 = vld [vmem:[%s737_s1 + $0x18] sm:$0xff]   ;;  %v586_v1 = vmov 0   ;;  %v587_v2 = vmov 0.0   ;;  %v513_v3 = vld [vmem:[%s737_s1 + $0x10] sm:$0xff]   ;;  %s748_s27 = smov (!%p193_p10, %s433_s27), 3  ;;  %v514_v4 = vld [vmem:[%s737_s1 + $0x8] sm:$0xff]   ;;  %v202_v8 = vlaneseq  ;;  %p525_p11 = scmp.ne.s32.totalorder %s694_s5, %s524_s19 }
  0x14   : > { %511 = vset.pattern.permute.xlu0 %v586_v1  ;;  %455 = vmatprep.subr.bf16.mxu0 %v587_v2  ;;  %s434_s6 = sshll.u32 %s748_s27, 3  ;;  %v515_v7 = vld [vmem:[%s737_s1] sm:$0xff]   ;;  %vm588_vm0 = vmmov 0   ;;  %vm249_vm3 = vcmask 523264   ;;  %s530_s12 = scalar_lea.vmem %s529_s11, 512 }
  0x15   : > { %456 = vmatpush3.bf16.msra.mxu0 %v512_v0  ;;  %s196_s9 = scalar_lea.vmem %s736_s0, %s434_s6  ;;  %463 = vmatprep.mubr.msk.bf16.mxu0 %vm588_vm0, %v587_v2  ;;  %v203_v9 = vand.u32 127, %v202_v8  ;;  %v442_v43 = vld [vmem:[%s738_s2] ss:$0 sm:$0xff]  ;;  %p526_p12 = pnand %p525_p11, %p655_p5 }
  0x16   : > { %457 = vmatprep.subr.bf16.mxu0 %v587_v2  ;;  %v200_v5 = vld [vmem:[%s196_s9] sm:$0xff]  ;;  %v201_v6 = vld [vmem:[%s196_s9 + $0x8] sm:$0xff]  ;;  %s696_s9 = scalar_lea.sflag [#allocation3], %s189_s22  ;;  %p531_p0 = scmp.lt.s32.totalorder %s694_s5, %s529_s11 }
  0x17   : > { %205 = vperm.xlu0 %511, %v200_v5   ;;  %v443_v46 = vld [vmem:[%s739_s3] ss:$0 sm:$0xff]  ;;  %p527_p13 = pneg %p526_p12  ;;  %p532_p1 = scmp.lt.s32.totalorder %s530_s12, %s524_s19 }
  0x19   : > { %458 = vmatpush3.bf16.msra.mxu0 %v513_v3  ;;  %p533_p2 = por %p532_p1, %p531_p0 }
  0x1a   : > { %459 = vmatprep.subr.bf16.mxu0 %v587_v2 }
  0x1b   : > { %208 = vperm.xlu0 %511, %v201_v6   ;;  %p534_p3 = pnand %p533_p2, %p527_p13 }
  0x1d   : > { %460 = vmatpush3.bf16.msra.mxu0 %v514_v4 }
  0x1e   : > { %461 = vmatprep.subr.bf16.mxu0 %v587_v2 }
  0x21   : > { %462 = vmatpush3.bf16.msra.mxu0 %v515_v7 }
  0x92   : > { %v206_v10 = vpop.permute.xlu0 %205 }
  0x93   : > { %vm210_vm1 = vcmp.eq.s32.totalorder %v206_v10, %v203_v9 }
  0x94   : > { %v435_v12 = vsel %vm210_vm1, 1.0, %v587_v2 }
  0x96   : > { %v209_v11 = vpop.permute.xlu0 %208 }
  0x97   : > { %vm211_vm2 = vcmp.eq.s32.totalorder %v209_v11, %v203_v9 }
  0x98   : > { %v436_v13 = vsel %vm211_vm2, 1.0, %v587_v2 }
  0x99   : > { %v216_v14 = vpack.c.bf16 %v436_v13, %v435_v12 }
  0x9b   : > { %464 = vmatmul.mubr.msk.bf16.vlgmr.msra.gmra.mxu0 %vm249_vm3, %v216_v14 }
 0x15b   : > { %v287_v15 = vpop.f32.mrf.mxu0 }
 0x15c   : > { %294 = vadd.xlane.f32.xlu1 %v287_v15 }
 0x15d   : > { %v465_v16 = vpop.f32.mrf.mxu0 }
 0x15f   : > { %v290_v17 = vpop.f32.mrf.mxu0 }
 0x160   : > { %296 = vadd.xlane.f32.xlu1 %v290_v17 }
 0x161   : > { %v466_v18 = vpop.f32.mrf.mxu0 }
 0x1e5   : > { %v295_v19 = vpop.xlane.xlu1 %294 }
 0x1e6   : > { %v299_v20 = vmul.f32 0.0078125, %v295_v19 }
 0x1e8   : > { %v301_v21 = vsub.f32 %v287_v15, %v299_v20 }
 0x1e9   : > { %v297_v22 = vpop.xlane.xlu1 %296 }
 0x1ea   : > { %v300_v23 = vmul.f32 0.0078125, %v297_v22  ;;  %v303_v24 = vmul.f32 %v301_v21, %v301_v21  ;;  %v337_v44 = vmul.f32 %v442_v43, %v301_v21 }
 0x1ec   : > { %v302_v25 = vsub.f32 %v290_v17, %v300_v23  ;;  %305 = vadd.xlane.f32.xlu0 %v303_v24 }
 0x1ee   : > { %v304_v26 = vmul.f32 %v302_v25, %v302_v25  ;;  %v338_v48 = vmul.f32 %v442_v43, %v302_v25 }
 0x1f0   : > { %307 = vadd.xlane.f32.xlu1 %v304_v26 }
 0x275   : > { %v306_v27 = vpop.xlane.xlu0 %305 }
 0x276   : > { %v310_v28 = vmul.f32 0.007874016, %v306_v27 }
 0x278   : > { %516 = vrsqrt.f32 %v310_v28  ;;  %vm314_vm4 = vcmp.eq.f32.partialorder %v310_v28, inf  ;;  %v317_v33 = vand.u32 2147483648, %v310_v28  ;;  %vm316_vm5 = vcmp.eq.f32.partialorder %v310_v28, 0.0 }
 0x279   : > { %v308_v29 = vpop.xlane.xlu1 %307 }
 0x27a   : > { %v311_v30 = vmul.f32 0.007874016, %v308_v29 }
 0x27c   : > { %518 = vrsqrt.f32 %v311_v30  ;;  %vm321_vm6 = vcmp.eq.f32.partialorder %v311_v30, inf  ;;  %v324_v39 = vand.u32 2147483648, %v311_v30  ;;  %vm323_vm7 = vcmp.eq.f32.partialorder %v311_v30, 0.0 }
 0x285   : > { %v517_v31 = vpop.eup %516 }
 0x286   : > { %v313_v32 = vmul.f32 %v517_v31, %v310_v28 }
 0x288   : > { %v315_v34 = vsel %vm314_vm4, %v310_v28, %v313_v32 }
 0x289   : > { %v519_v35 = vpop.eup %518  ;;  %v318_v36 = vsel %vm316_vm5, %v317_v33, %v315_v34 }
 0x28a   : > { %v326_v37 = vadd.f32 1e-06, %v318_v36  ;;  %v320_v38 = vmul.f32 %v519_v35, %v311_v30 }
 0x28c   : > { %520 = vrcp.f32 %v326_v37  ;;  %v322_v40 = vsel %vm321_vm6, %v311_v30, %v320_v38 }
 0x28d   : > { %v325_v41 = vsel %vm323_vm7, %v324_v39, %v322_v40 }
 0x28e   : > { %v327_v42 = vadd.f32 1e-06, %v325_v41 }
 0x290   : > { %522 = vrcp.f32 %v327_v42 }
 0x299   : > { %v521_v45 = vpop.eup %520 }
 0x29a   : > { %v339_v47 = vmul.f32 %v521_v45, %v337_v44 }
 0x29c   : > { %v348_v49 = vadd.f32 %v443_v46, %v339_v47 }
 0x29d   : > { %v523_v50 = vpop.eup %522 }
 0x29e   : > { %v340_v51 = vmul.f32 %v523_v50, %v338_v48  ;;  %350 = vst [vmem:[%s191_s30] sm:$0xff] %v348_v49 }
 0x2a0   : > { %v349_v52 = vadd.f32 %v443_v46, %v340_v51 }
 0x2a2   : > { %351 = vst [vmem:[%s191_s30 + $0x8] sm:$0xff] %v349_v52 }
 0x2a3   : > { %537 = shalt.err (!%p534_p3)
}
 0x2a4   : > { %s538_s13 = scalar_lea.hbm %s692_s8, 256  ;;  %s542_s22 = scalar_lea.hbm %s740_s4, 512 }
 0x2a5   : > { %p539_p4 = scmp.ne.s32.totalorder %s692_s8, %s538_s13  ;;  %p543_p9 = scmp.lt.s32.totalorder %s692_s8, %s740_s4 }
 0x2a6   : > { %p544_p10 = scmp.lt.s32.totalorder %s542_s22, %s538_s13 }
 0x2a7   : > { %p540_p7 = pnand %p539_p4, %p655_p5 }
 0x2a8   : > { %p545_p11 = por %p544_p10, %p543_p9 }
 0x2a9   : > { %p541_p8 = pneg %p540_p7 }
 0x2ab   : > { %p546_p12 = pnand %p545_p11, %p541_p8 }
 0x2ad   : > { %549 = shalt.err (!%p546_p12)
}
 0x2ae   : > { %s590_s28 = smov 128   ;;  %s591_s29 = smov 8  }
 0x2af   : > { %467 = dma.vmem_to_hbm [thread:$0]  (%p655_p5), %s694_s5, 256, %s692_s8, %s696_s9, %s590_s28, %s590_s28, %s591_s29  }
 0x2b0 PF: > { %p473_p13 = scmp.ge.s32.totalorder %s584_s18, 2  ;;  %s381_s30 = sand.u32 1, %s572_s15  }
 0x2b1   : > { %s382_s6 = scalar_lea.sflag [#allocation3], %s381_s30 }
 0x2b2   : > { %p470_p0 = pnand %p473_p13, %p659_p6 }
 0x2b4   : > { %p471_p1 = pneg %p470_p0 }
 0x2b6   : > { %567 = dma.done.wait (%p471_p1), %s382_s6, 256  }
 0x2b7   : > { %569 = vsyncadd (%p471_p1), %s382_s6, 4294967040  ;;  %p14_p2 = scmp.ge.s32.totalorder %s642_s21, 4   ;;  %s743_s15 = smov %s576_s16 }
 0x2b8   : > { %s744_s16 = smov %s580_s17  ;;  %s745_s17 = smov %s653_s24 }
 0x2b9   : > { %s746_s18 = smov %s642_s21  ;;  %16 = sbr.rel (!%p14_p2) target bundleno = 3 (0x3), region = 71 }
 0x2be   :  { %387 = vsyncpa [#allocation3], 1 }
 0x2bf   :  { %389 = vsyncpa [#allocation3 + $0x1], 1 }

</bundles_post_ra>
